<compile_context>
chip_gen: v7x
topology: tpu7x:2x2x1
jax: 0.10.0
libtpu: 0.0.40
codegen_flags: <defaults>
</compile_context>

<pallas_src>
import functools

import jax
import jax.numpy as jnp
from jax import lax
from jax.experimental import pallas as pl
from jax.experimental.pallas import tpu as pltpu


POOL_LEVELS = 3          # the three MaxPool2d(2) stages -> final 8x8 grid
NPIX = 8 * 8 * 4 ** POOL_LEVELS   # 4096 pixels entering conv1


# ----------------------------- layout plumbing ------------------------------
def rearrange_pooled(x_pooled):
    """(B, C, 64, 64) f32 -> (B, C, 4096) bf16 with pixels lane-dense.

    Pixel bit order (msb -> lsb): h0 w0 h1 w1 h2 w2 h_out(3) w_out(3), i.e. the
    finest 2x2 refinement bits first.  Each MaxPool2d(2) inside the kernel is
    then a max over 4 lane-contiguous quarters of the pixel axis, and after all
    three pools the residual order is exactly torch's h_out*8 + w_out.
    This runs on the already pre-pooled tensor (64 KiB/batch) so the transpose
    is negligible HBM traffic.  The bf16 cast is folded in here because the
    stage-1 matmul consumes bf16 anyway (pooling happened in f32 before this).
    """
    B, C, H, W = x_pooled.shape
    L = POOL_LEVELS
    assert H == W == 8 * (1 << L)
    x = x_pooled.reshape((B, C, 8) + (2,) * L + (8,) + (2,) * L)
    # axes: 0 B | 1 C | 2 h_out | 3..2+L h-bits (coarse->fine) | 3+L w_out |
    #       4+L..3+2L w-bits (coarse->fine)
    perm = [0, 1]
    for l in range(L):                         # l = 0 is the finest level
        perm += [2 + L - l, 3 + 2 * L - l]     # (h_bit_l, w_bit_l) finest first
    perm += [2, 3 + L]                         # h_out, w_out least significant
    return jnp.transpose(x, perm).reshape(B, C, H * W).astype(jnp.bfloat16)


def fold_bn(w, b, gamma, beta, mean, var, eps=1e-5):
    """Fold eval-mode BatchNorm2d into a 1x1 conv (torch (Cout, Cin) weight)."""
    s = gamma / jnp.sqrt(var + eps)
    return w * s[:, None], (b - mean) * s + beta


def prepare_params(params):
    """One-time parameter prep (BN fold, bf16 casts, transposes, bias reshapes)."""
    w1, b1 = fold_bn(params['w1'], params['b1'], *params['bn1'])
    w2, b2 = fold_bn(params['w2'], params['b2'], *params['bn2'])
    w3, b3 = fold_bn(params['w3'], params['b3'], *params['bn3'])
    return {
        # Stage weights in bf16 (single MXU pass, f32 accumulation); biases f32.
        'w1': w1.astype(jnp.bfloat16), 'b1': b1.reshape(-1, 1),
        'w2': w2.astype(jnp.bfloat16), 'b2': b2.reshape(-1, 1),
        'w3': w3.astype(jnp.bfloat16), 'b3': b3.reshape(-1, 1),
        # Feature order already matches torch's c*64 + h*8 + w -> plain transpose.
        'wfc1': params['wfc1'].T.astype(jnp.bfloat16),
        'bfc1': params['bfc1'].reshape(1, -1),
        'wfc2': params['wfc2'].T, 'bfc2': params['bfc2'].reshape(1, -1),
        'wfc3': params['wfc3'].T, 'bfc3': params['bfc3'].reshape(1, -1),
    }


# ----------------------------- Pallas kernel --------------------------------
def cnn_stages_kernel(x_ref, w1_ref, b1_ref, w2_ref, b2_ref, w3_ref, b3_ref,
                      o_ref):
    """Per-batch fused: 3 x { 1x1 conv (+folded BN) + ReLU + MaxPool2d(2) }."""

    def stage(h_bf16, w_ref, b_ref):
        # 1x1 conv as (Cout, Cin) @ (Cin, Npix) on the MXU.  bf16 operands,
        # f32 accumulation, single pass (no Precision.HIGHEST).
        y = jnp.dot(w_ref[...], h_bf16, preferred_element_type=jnp.float32)
        y = jnp.maximum(y + b_ref[...], 0.0)
        # MaxPool2d(2) == max over the 4 lane-contiguous quarters of the pixel
        # axis (pixel bits are ordered finest-refinement-first by the wrapper).
        s = y.shape[1] // 4
        return jnp.maximum(
            jnp.maximum(y[:, 0 * s:1 * s], y[:, 1 * s:2 * s]),
            jnp.maximum(y[:, 2 * s:3 * s], y[:, 3 * s:4 * s]))

    h = stage(x_ref[...], w1_ref, b1_ref)                # (16, 1024) f32
    h = stage(h.astype(jnp.bfloat16), w2_ref, b2_ref)    # (32, 256)  f32
    h = stage(h.astype(jnp.bfloat16), w3_ref, b3_ref)    # (64, 64)   f32
    # (channel, n) row-major == torch's x.view(B, -1) order.
    o_ref[...] = h


# ----------------------------- forward wrapper ------------------------------
@functools.partial(jax.jit, static_argnames=('radius',))
def cnn_pre_forward(x_nchw, prep, radius):
    B, Cin, H, W = x_nchw.shape
    k = int(radius) // 32
    assert k >= 1, "radius must be >= 32"
    assert H == W == 64 * k, "spatial size must reduce to 8x8 after all pools"

    # MaxPool_pre on the raw NCHW input, in the wrapper: one mem-bound pass
    # that reads the big input exactly once and writes only 64 KiB/batch.
    if k > 1:
        x_nchw = lax.reduce_window(x_nchw, -jnp.inf, lax.max,
                                   (1, 1, k, k), (1, 1, k, k), 'VALID')

    xr = rearrange_pooled(x_nchw)              # (B, Cin, 4096) bf16, tiny

    const = lambda a: pl.BlockSpec(a.shape, lambda b: (0, 0))
    feat = pl.pallas_call(
        cnn_stages_kernel,
        grid=(B,),
        in_specs=[
            pl.BlockSpec((None, Cin, NPIX), lambda b: (b, 0, 0)),
            const(prep['w1']), const(prep['b1']),
            const(prep['w2']), const(prep['b2']),
            const(prep['w3']), const(prep['b3']),
        ],
        out_specs=pl.BlockSpec((None, 64, 64), lambda b: (b, 0, 0)),
        out_shape=jax.ShapeDtypeStruct((B, 64, 64), jnp.float32),
        compiler_params=pltpu.CompilerParams(
            dimension_semantics=("parallel",)),   # batch across TCs (v7x)
    )(xr, prep['w1'], prep['b1'], prep['w2'], prep['b2'], prep['w3'], prep['b3'])

    # FC head: only B rows of work, dominated by streaming wfc1 -> leave it to
    # XLA (no second pallas_call, no feature HBM round trip); wfc1 streamed as
    # bf16 with f32 accumulation.
    f = feat.reshape(B, 64 * 64)
    z = jnp.dot(f.astype(jnp.bfloat16), prep['wfc1'],
                preferred_element_type=jnp.float32) + prep['bfc1']
    z = jnp.maximum(z, 0.0)
    z = jnp.dot(z, prep['wfc2'], precision=lax.Precision.HIGHEST) + prep['bfc2']
    z = jnp.maximum(z, 0.0)
    return jnp.dot(z, prep['wfc3'], precision=lax.Precision.HIGHEST) + prep['bfc3']


# ----------------------------- pure-JAX reference ----------------------------
def reference_forward(x_nchw, params, radius):
    """Straight f32/HIGHEST NCHW reference (unfused BN, reduce_window pools)."""
    k = int(radius) // 32
    hi = lax.Precision.HIGHEST

    def pool(t, s):
        return lax.reduce_window(t, -jnp.inf, lax.max,
                                 (1, 1, s, s), (1, 1, s, s), 'VALID')

    h = pool(x_nchw, k) if k > 1 else x_nchw

    def block(h, w, b, bn):
        gamma, beta, mean, var = bn
        y = jnp.einsum('bchw,oc->bohw', h, w, precision=hi) + b[None, :, None, None]
        y = (y - mean[None, :, None, None]) * (
            gamma[None, :, None, None] / jnp.sqrt(var[None, :, None, None] + 1e-5)
        ) + beta[None, :, None, None]
        return pool(jnp.maximum(y, 0.0), 2)

    h = block(h, params['w1'], params['b1'], params['bn1'])
    h = block(h, params['w2'], params['b2'], params['bn2'])
    h = block(h, params['w3'], params['b3'], params['bn3'])
    feat = h.reshape(h.shape[0], -1)           # torch NCHW flatten order
    z = jnp.dot(feat, params['wfc1'].T, precision=hi) + params['bfc1']
    z = jnp.maximum(z, 0.0)
    z = jnp.maximum(jnp.dot(z, params['wfc2'].T, precision=hi) + params['bfc2'], 0.0)
    return jnp.dot(z, params['wfc3'].T, precision=hi) + params['bfc3']


# ----------------------------- main ------------------------------------------
if __name__ == "__main__":
    n_var, radius, dropout = 4, 64, 0.1        # MaxPool_pre kernel = 64//32 = 2
    B = 2
    k = radius // 32
    H = W = 64 * k                             # 128 -> reduces to 8x8 after pools

    keys = iter(jax.random.split(jax.random.PRNGKey(0), 32))

    def nrm(shape, scale=0.1):
        return scale * jax.random.normal(next(keys), shape, jnp.float32)

    def bn_params(c):                          # (gamma, beta, running_mean, running_var)
        return (1.0 + nrm((c,)), nrm((c,)), nrm((c,)),
                jax.random.uniform(next(keys), (c,), jnp.float32, 0.5, 1.5))

    params = {
        # torch layout: conv weight (Cout, Cin) for 1x1 convs, Linear weight (out, in)
        'w1': nrm((16, n_var)), 'b1': nrm((16,)), 'bn1': bn_params(16),
        'w2': nrm((32, 16)),    'b2': nrm((32,)), 'bn2': bn_params(32),
        'w3': nrm((64, 32)),    'b3': nrm((64,)), 'bn3': bn_params(64),
        'wfc1': nrm((256, 64 * 8 * 8), 0.02), 'bfc1': nrm((256,)),
        'wfc2': nrm((64, 256)),               'bfc2': nrm((64,)),
        'wfc3': nrm((1, 64)),                 'bfc3': nrm((1,)),
    }

    x = jax.random.normal(next(keys), (B, n_var, H, W), jnp.float32)

    prep = prepare_params(params)              # one-time prep (BN fold, bf16, transposes)
    out = jax.block_until_ready(cnn_pre_forward(x, prep, radius=radius))
    ref = reference_forward(x, params, radius)

    assert out.shape == (B, 1), out.shape
    # Reference is pure f32/HIGHEST (no mirrored bf16), so the tolerance covers
    # the bf16 weight/activation streaming in the conv stages and fc1.
    assert jnp.allclose(out, ref, rtol=2e-2, atol=2e-2), (out, ref)
    print("KERNEL_OK")
</pallas_src>

<mosaic_0001>
module attributes {stable_mosaic.version = 11 : i64} {
  func.func @cnn_stages_kernel(%arg0: i32, %arg1: memref<1x4x4096xbf16, #tpu.memory_space<vmem>>, %arg2: memref<16x4xbf16, #tpu.memory_space<vmem>>, %arg3: memref<16x1xf32, #tpu.memory_space<vmem>>, %arg4: memref<32x16xbf16, #tpu.memory_space<vmem>>, %arg5: memref<32x1xf32, #tpu.memory_space<vmem>>, %arg6: memref<64x32xbf16, #tpu.memory_space<vmem>>, %arg7: memref<64x1xf32, #tpu.memory_space<vmem>>, %arg8: memref<1x64x64xf32, #tpu.memory_space<vmem>>) attributes {dimension_semantics = [#tpu.dimension_semantics<parallel>], iteration_bounds = array<i64: 2>, scalar_prefetch = 0 : i64, scratch_operands = 0 : i64, tpu.core_type = #tpu.core_type<tc>, window_params = [{transform_indices = @transform_0, window_bounds = array<i64: 1, 4, 4096>}, {pipeline_mode = #tpu.pipeline_mode<synchronous>, transform_indices = @transform_1, window_bounds = array<i64: 16, 4>}, {pipeline_mode = #tpu.pipeline_mode<synchronous>, transform_indices = @transform_2, window_bounds = array<i64: 16, 1>}, {pipeline_mode = #tpu.pipeline_mode<synchronous>, transform_indices = @transform_3, window_bounds = array<i64: 32, 16>}, {pipeline_mode = #tpu.pipeline_mode<synchronous>, transform_indices = @transform_4, window_bounds = array<i64: 32, 1>}, {pipeline_mode = #tpu.pipeline_mode<synchronous>, transform_indices = @transform_5, window_bounds = array<i64: 64, 32>}, {pipeline_mode = #tpu.pipeline_mode<synchronous>, transform_indices = @transform_6, window_bounds = array<i64: 64, 1>}, {transform_indices = @transform_7, window_bounds = array<i64: 1, 64, 64>}]} {
    %c0 = arith.constant 0 : index
    %c0_0 = arith.constant 0 : index
    %c0_1 = arith.constant 0 : index
    %0 = vector.load %arg1[%c0, %c0_0, %c0_1] : memref<1x4x4096xbf16, #tpu.memory_space<vmem>>, vector<1x4x4096xbf16>
    %1 = vector.shape_cast %0 : vector<1x4x4096xbf16> to vector<4x4096xbf16>
    %c0_2 = arith.constant 0 : index
    %c0_3 = arith.constant 0 : index
    %2 = vector.load %arg2[%c0_2, %c0_3] : memref<16x4xbf16, #tpu.memory_space<vmem>>, vector<16x4xbf16>
    %cst = arith.constant dense<0.000000e+00> : vector<16x4096xf32>
    %3 = tpu.matmul %2, %1, %cst {dimension_numbers = #tpu.dot_dimension_numbers<[1], [0], [0], [1], [0, 0, 1, 1], [], []>} : vector<16x4xbf16>, vector<4x4096xbf16>, vector<16x4096xf32> -> vector<16x4096xf32>
    %c0_4 = arith.constant 0 : index
    %c0_5 = arith.constant 0 : index
    %4 = vector.load %arg3[%c0_4, %c0_5] : memref<16x1xf32, #tpu.memory_space<vmem>>, vector<16x1xf32>
    %5 = vector.broadcast %4 : vector<16x1xf32> to vector<16x4096xf32>
    %6 = arith.addf %3, %5 : vector<16x4096xf32>
    %cst_6 = arith.constant 0.000000e+00 : f32
    %7 = vector.broadcast %cst_6 : f32 to vector<16x4096xf32>
    %8 = arith.maximumf %6, %7 : vector<16x4096xf32>
    %9 = vector.extract_strided_slice %8 {offsets = [0, 0], sizes = [16, 1024], strides = [1, 1]} : vector<16x4096xf32> to vector<16x1024xf32>
    %10 = vector.extract_strided_slice %8 {offsets = [0, 1024], sizes = [16, 1024], strides = [1, 1]} : vector<16x4096xf32> to vector<16x1024xf32>
    %11 = arith.maximumf %9, %10 : vector<16x1024xf32>
    %12 = vector.extract_strided_slice %8 {offsets = [0, 2048], sizes = [16, 1024], strides = [1, 1]} : vector<16x4096xf32> to vector<16x1024xf32>
    %13 = vector.extract_strided_slice %8 {offsets = [0, 3072], sizes = [16, 1024], strides = [1, 1]} : vector<16x4096xf32> to vector<16x1024xf32>
    %14 = arith.maximumf %12, %13 : vector<16x1024xf32>
    %15 = arith.maximumf %11, %14 : vector<16x1024xf32>
    %16 = arith.truncf %15 : vector<16x1024xf32> to vector<16x1024xbf16>
    %c0_7 = arith.constant 0 : index
    %c0_8 = arith.constant 0 : index
    %17 = vector.load %arg4[%c0_7, %c0_8] : memref<32x16xbf16, #tpu.memory_space<vmem>>, vector<32x16xbf16>
    %cst_9 = arith.constant dense<0.000000e+00> : vector<32x1024xf32>
    %18 = tpu.matmul %17, %16, %cst_9 {dimension_numbers = #tpu.dot_dimension_numbers<[1], [0], [0], [1], [0, 0, 1, 1], [], []>} : vector<32x16xbf16>, vector<16x1024xbf16>, vector<32x1024xf32> -> vector<32x1024xf32>
    %c0_10 = arith.constant 0 : index
    %c0_11 = arith.constant 0 : index
    %19 = vector.load %arg5[%c0_10, %c0_11] : memref<32x1xf32, #tpu.memory_space<vmem>>, vector<32x1xf32>
    %20 = vector.broadcast %19 : vector<32x1xf32> to vector<32x1024xf32>
    %21 = arith.addf %18, %20 : vector<32x1024xf32>
    %cst_12 = arith.constant 0.000000e+00 : f32
    %22 = vector.broadcast %cst_12 : f32 to vector<32x1024xf32>
    %23 = arith.maximumf %21, %22 : vector<32x1024xf32>
    %24 = vector.extract_strided_slice %23 {offsets = [0, 0], sizes = [32, 256], strides = [1, 1]} : vector<32x1024xf32> to vector<32x256xf32>
    %25 = vector.extract_strided_slice %23 {offsets = [0, 256], sizes = [32, 256], strides = [1, 1]} : vector<32x1024xf32> to vector<32x256xf32>
    %26 = arith.maximumf %24, %25 : vector<32x256xf32>
    %27 = vector.extract_strided_slice %23 {offsets = [0, 512], sizes = [32, 256], strides = [1, 1]} : vector<32x1024xf32> to vector<32x256xf32>
    %28 = vector.extract_strided_slice %23 {offsets = [0, 768], sizes = [32, 256], strides = [1, 1]} : vector<32x1024xf32> to vector<32x256xf32>
    %29 = arith.maximumf %27, %28 : vector<32x256xf32>
    %30 = arith.maximumf %26, %29 : vector<32x256xf32>
    %31 = arith.truncf %30 : vector<32x256xf32> to vector<32x256xbf16>
    %c0_13 = arith.constant 0 : index
    %c0_14 = arith.constant 0 : index
    %32 = vector.load %arg6[%c0_13, %c0_14] : memref<64x32xbf16, #tpu.memory_space<vmem>>, vector<64x32xbf16>
    %cst_15 = arith.constant dense<0.000000e+00> : vector<64x256xf32>
    %33 = tpu.matmul %32, %31, %cst_15 {dimension_numbers = #tpu.dot_dimension_numbers<[1], [0], [0], [1], [0, 0, 1, 1], [], []>} : vector<64x32xbf16>, vector<32x256xbf16>, vector<64x256xf32> -> vector<64x256xf32>
    %c0_16 = arith.constant 0 : index
    %c0_17 = arith.constant 0 : index
    %34 = vector.load %arg7[%c0_16, %c0_17] : memref<64x1xf32, #tpu.memory_space<vmem>>, vector<64x1xf32>
    %35 = vector.broadcast %34 : vector<64x1xf32> to vector<64x256xf32>
    %36 = arith.addf %33, %35 : vector<64x256xf32>
    %cst_18 = arith.constant 0.000000e+00 : f32
    %37 = vector.broadcast %cst_18 : f32 to vector<64x256xf32>
    %38 = arith.maximumf %36, %37 : vector<64x256xf32>
    %39 = vector.extract_strided_slice %38 {offsets = [0, 0], sizes = [64, 64], strides = [1, 1]} : vector<64x256xf32> to vector<64x64xf32>
    %40 = vector.extract_strided_slice %38 {offsets = [0, 64], sizes = [64, 64], strides = [1, 1]} : vector<64x256xf32> to vector<64x64xf32>
    %41 = arith.maximumf %39, %40 : vector<64x64xf32>
    %42 = vector.extract_strided_slice %38 {offsets = [0, 128], sizes = [64, 64], strides = [1, 1]} : vector<64x256xf32> to vector<64x64xf32>
    %43 = vector.extract_strided_slice %38 {offsets = [0, 192], sizes = [64, 64], strides = [1, 1]} : vector<64x256xf32> to vector<64x64xf32>
    %44 = arith.maximumf %42, %43 : vector<64x64xf32>
    %45 = arith.maximumf %41, %44 : vector<64x64xf32>
    %c0_19 = arith.constant 0 : index
    %c0_20 = arith.constant 0 : index
    %c0_21 = arith.constant 0 : index
    %46 = vector.load %arg8[%c0_19, %c0_20, %c0_21] : memref<1x64x64xf32, #tpu.memory_space<vmem>>, vector<1x64x64xf32>
    %47 = vector.shape_cast %46 : vector<1x64x64xf32> to vector<64x64xf32>
    %48 = vector.shape_cast %45 : vector<64x64xf32> to vector<1x64x64xf32>
    tpu.vector_store %arg8[%c0_19, %c0_20, %c0_21], %48 {strides = array<i32>} : memref<1x64x64xf32, #tpu.memory_space<vmem>>, vector<1x64x64xf32>,
    return
  }
  func.func @transform_0(%arg0: i32) -> (i32, i32, i32) {
    %c0_i32 = arith.constant 0 : i32
    %c0_i32_0 = arith.constant 0 : i32
    %c0_i32_1 = arith.constant 0 : i32
    return %arg0, %c0_i32, %c0_i32_0 : i32, i32, i32
  }
  func.func @transform_1(%arg0: i32) -> (i32, i32) {
    %c0_i32 = arith.constant 0 : i32
    %c0_i32_0 = arith.constant 0 : i32
    %c0_i32_1 = arith.constant 0 : i32
    return %c0_i32, %c0_i32_0 : i32, i32
  }
  func.func @transform_2(%arg0: i32) -> (i32, i32) {
    %c0_i32 = arith.constant 0 : i32
    %c0_i32_0 = arith.constant 0 : i32
    %c0_i32_1 = arith.constant 0 : i32
    return %c0_i32, %c0_i32_0 : i32, i32
  }
  func.func @transform_3(%arg0: i32) -> (i32, i32) {
    %c0_i32 = arith.constant 0 : i32
    %c0_i32_0 = arith.constant 0 : i32
    %c0_i32_1 = arith.constant 0 : i32
    return %c0_i32, %c0_i32_0 : i32, i32
  }
  func.func @transform_4(%arg0: i32) -> (i32, i32) {
    %c0_i32 = arith.constant 0 : i32
    %c0_i32_0 = arith.constant 0 : i32
    %c0_i32_1 = arith.constant 0 : i32
    return %c0_i32, %c0_i32_0 : i32, i32
  }
  func.func @transform_5(%arg0: i32) -> (i32, i32) {
    %c0_i32 = arith.constant 0 : i32
    %c0_i32_0 = arith.constant 0 : i32
    %c0_i32_1 = arith.constant 0 : i32
    return %c0_i32, %c0_i32_0 : i32, i32
  }
  func.func @transform_6(%arg0: i32) -> (i32, i32) {
    %c0_i32 = arith.constant 0 : i32
    %c0_i32_0 = arith.constant 0 : i32
    %c0_i32_1 = arith.constant 0 : i32
    return %c0_i32, %c0_i32_0 : i32, i32
  }
  func.func @transform_7(%arg0: i32) -> (i32, i32, i32) {
    %c0_i32 = arith.constant 0 : i32
    %c0_i32_0 = arith.constant 0 : i32
    %c0_i32_1 = arith.constant 0 : i32
    return %arg0, %c0_i32, %c0_i32_0 : i32, i32, i32
  }
}

</mosaic_0001>

<bundles_post_ra>
// kernel: cnn_pre_forward.1
= control target key start
LH: loop header
LB: loop body
LE: loop exit
PB: predicated region body
PF: predicated region fallthrough
CT: control target
= control target key end

     0   :  { %s2150_s24 = smov 0   ;;  %s2707_s0 = inlined_call_operand.vmem [shape: bf16[2,4,4096], index: 0, kind: input, shape index: {}]   ;;  %s2708_s1 = inlined_call_operand.vmem [shape: bf16[16,4], index: 1, kind: input, shape index: {}]   ;;  %s2709_s2 = inlined_call_operand.vmem [shape: f32[16,1], index: 2, kind: input, shape index: {}]   ;;  %s2710_s3 = inlined_call_operand.vmem [shape: bf16[32,16], index: 3, kind: input, shape index: {}]   ;;  %s2711_s4 = inlined_call_operand.vmem [shape: f32[32,1], index: 4, kind: input, shape index: {}]   ;;  %s2712_s5 = inlined_call_operand.vmem [shape: bf16[64,32], index: 5, kind: input, shape index: {}]   ;;  %s2713_s6 = inlined_call_operand.vmem [shape: f32[64,1], index: 6, kind: input, shape index: {}]   ;;  %s2714_s7 = inlined_call_operand.vmem [shape: f32[2,64,64], index: 7, kind: output, shape index: {}]  }
   0x1 LB: > { %s2007_s25 = sadd.s32 4294967295, %s2105_s24   ;;  %p2011_p0 = scmp.ge.s32.totalorder %s2105_s24, 1  ;;  %s2105_s24 = sphi %s2150_s24, %s17_s24  }
   0x2   : > { %p237_p1 = scmp.lt.s32.totalorder %s2105_s24, 3 }
   0x4   : > { %p238_p2 = pnand %p2011_p0, %p237_p1 }
   0x5   : > { %p269_p3 = scmp.lt.s32.totalorder (!%p238_p2), %s2007_s25, 1  ;;  %v319_v0 = vlaneseq (!%p238_p2)  ;;  %v2107_v1 = vmov (!%p238_p2), 1983009808   ;;  %v2715_v3 = vmov (!%p238_p2), 0   ;;  %v290_v4 = vld [vmem:[%s2709_s2] sm:$0xff] (!%p238_p2)  ;;  %v291_v7 = vld [vmem:[%s2709_s2 + $0x8] sm:$0xff] (!%p238_p2) }
   0x6   : > { %241 = sbr.rel (%p238_p2) target bundleno = 942 (0x3ae), region = 48  ;;  %v317_v2 = vunpack.c.l.s4 (!%p238_p2), %v2107_v1  ;;  %584 = vmatprep.mubr.bf16.mxu0 (!%p238_p2), %v2715_v3  ;;  %627 = vmatprep.mubr.bf16.mxu1 (!%p238_p2), %v2715_v3  ;;  %vm455_vm0 = vcmask (!%p238_p2), 1041408   ;;  %v1366_v18 = vld [vmem:[%s2711_s4 + $0x10] sm:$0xff] (!%p238_p2)  ;;  %v2197_v26 = vld [vmem:[%s2708_s1] sm:$0xff] (!%p238_p2)   ;;  %vm451_vm1 = vcmask (!%p238_p2), 31744   ;;  %vm1398_vm2 = vcmask (!%p238_p2), 130048  }
   0x7   : > { %v320_v5 = vshrl.u32 (!%p238_p2), %v319_v0, 7  ;;  %2082 = vset.pattern.permute.xlu0 (!%p238_p2), %v2715_v3  ;;  %2083 = vset.pattern.permute.xlu1 (!%p238_p2), %v2715_v3  ;;  %v1685_v35 = vld [vmem:[%s2713_s6] sm:$0xff] (!%p238_p2)  ;;  %v1687_v39 = vld [vmem:[%s2713_s6 + $0x10] sm:$0xff] (!%p238_p2)  ;;  %vm1753_vm3 = vcmask (!%p238_p2), 261120   ;;  %s2109_s9 = smov (!%p238_p2), 64   ;;  %vm1943_vm4 = vcmask (!%p238_p2), 523264  }
   0x8   : > { %v318_v6 = vunpack.c.0.s8 (!%p238_p2), %v317_v2  ;;  %294 = vperm.xlu0 (!%p238_p2), %2082, %v290_v4   ;;  %v1689_v45 = vld [vmem:[%s2713_s6 + $0x20] sm:$0xff] (!%p238_p2)  ;;  %v1691_v49 = vld [vmem:[%s2713_s6 + $0x30] sm:$0xff] (!%p238_p2) }
   0xa   : > { %v2178_v8 = vsub.s32 (!%p238_p2), %v318_v6, %v320_v5 }
   0xc   : > { %299 = vperm.xlu0 (!%p238_p2), %2082, %v291_v7  }
   0xd   : > { %s2720_s25 = smov (!%p269_p3, %s2007_s25), 1 }
   0xe   : > { %s2069_s28 = sshll.u32 %s2720_s25, 6 }
   0xf   : > { %s2176_s10 = scalar_lea.vmem %s2707_s0, %s2069_s28  ;;  %s2678_s12 = scalar_lea.vmem %s2714_s7, %s2069_s28 }
  0x10   : > { %v280_v9 = vld [vmem:[%s2176_s10] sm:$0xff]  ;;  %v281_v10 = vld [vmem:[%s2176_s10 + $0x8] sm:$0xff]  ;;  %v282_v11 = vld [vmem:[%s2176_s10 + $0x10] sm:$0xff]  ;;  %1380 = vperm.xlu0 %2082, %v1366_v18  }
  0x11   : > { %v322_v12 = vrot.slane %v280_v9, %v2178_v8  ;;  %v315_v13 = vcombine.high %v280_v9, %v280_v9  ;;  %v339_v14 = vrot.slane %v281_v10, %v2178_v8  ;;  %v332_v15 = vcombine.high %v281_v10, %v281_v10  ;;  %v283_v29 = vld [vmem:[%s2176_s10 + $0x18] sm:$0xff]  ;;  %v284_v38 = vld [vmem:[%s2176_s10 + $0x20] sm:$0xff]  ;;  %v285_v48 = vld [vmem:[%s2176_s10 + $0x28] sm:$0xff] }
  0x12   : > { %v356_v16 = vrot.slane %v282_v11, %v2178_v8  ;;  %v349_v17 = vcombine.high %v282_v11, %v282_v11  ;;  %v366_v34 = vcombine.high %v283_v29, %v283_v29  ;;  %v373_v36 = vrot.slane %v283_v29, %v2178_v8  ;;  %v286_v57 = vld [vmem:[%s2176_s10 + $0x30] sm:$0xff]  ;;  %v287_v1 = vld [vmem:[%s2176_s10 + $0x38] sm:$0xff] }
  0x13   : > { %v330_v19 = vcombine.high %v322_v12, %v322_v12  ;;  %v457_v20 = vsel %vm455_vm0, %v322_v12, 0  ;;  %v329_v21 = vrot.slane %v315_v13, %v2178_v8  ;;  %v347_v22 = vcombine.high %v339_v14, %v339_v14  ;;  %v1367_v18 = vld [vmem:[%s2711_s4 + $0x18] sm:$0xff] }
  0x14   : > { %v346_v23 = vrot.slane %v332_v15, %v2178_v8  ;;  %v363_v27 = vrot.slane %v349_v17, %v2178_v8  ;;  %v469_v30 = vsel %vm455_vm0, %v339_v14, 0  ;;  %v364_v31 = vcombine.high %v356_v16, %v356_v16  ;;  %1695 = vperm.xlu0 %2082, %v1685_v35   ;;  %v1365_v17 = vld [vmem:[%s2711_s4 + $0x8] sm:$0xff] }
  0x15   : > { %2017 = vmatprep.subr.msk.bf16.mxu0 %vm455_vm0, %v330_v19  ;;  %v331_v24 = vcombine.high %v329_v21, %v329_v21  ;;  %v463_v25 = vsel %vm455_vm0, %v329_v21, 0  ;;  %v380_v37 = vrot.slane %v366_v34, %v2178_v8  ;;  %v481_v40 = vsel %vm455_vm0, %v356_v16, 0  ;;  %v1364_v16 = vld [vmem:[%s2711_s4] sm:$0xff]  ;;  %v1686_v19 = vld [vmem:[%s2713_s6 + $0x8] sm:$0xff] }
  0x16   : > { %553 = vmatpush1.bf16.msra.mxu0 %v457_v20  ;;  %v348_v28 = vcombine.high %v346_v23, %v346_v23  ;;  %v475_v32 = vsel %vm455_vm0, %v346_v23, 0  ;;  %v365_v33 = vcombine.high %v363_v27, %v363_v27  ;;  %v381_v41 = vcombine.high %v373_v36, %v373_v36  ;;  %1370 = vperm.xlu1 %2083, %v1364_v16   ;;  %v1688_v20 = vld [vmem:[%s2713_s6 + $0x18] sm:$0xff] }
  0x17   : > { %2019 = vmatprep.subr.msk.bf16.mxu1 %vm455_vm0, %v331_v24  ;;  %2021 = vmatprep.subr.msk.bf16.mxu0 %vm455_vm0, %v347_v22  ;;  %v487_v42 = vsel %vm455_vm0, %v363_v27, 0  ;;  %v382_v43 = vcombine.high %v380_v37, %v380_v37  ;;  %v383_v44 = vcombine.high %v284_v38, %v284_v38  ;;  %v390_v46 = vrot.slane %v284_v38, %v2178_v8  ;;  %v1690_v24 = vld [vmem:[%s2713_s6 + $0x28] sm:$0xff] }
  0x18   : > { %596 = vmatpush1.bf16.msra.mxu1 %v463_v25  ;;  %1705 = vperm.xlu0 %2082, %v1687_v39   ;;  %v493_v50 = vsel %vm455_vm0, %v373_v36, 0  ;;  %v499_v52 = vsel %vm455_vm0, %v380_v37, 0  ;;  %v400_v54 = vcombine.high %v285_v48, %v285_v48  ;;  %v407_v55 = vrot.slane %v285_v48, %v2178_v8 }
  0x19   : > { %2018 = vmatmul.mubr.msk.bf16.vlgmr.msra.gmra.mrb[0].mxu0 %vm451_vm1, %v2197_v26  ;;  %2023 = vmatprep.subr.msk.bf16.mxu1 %vm455_vm0, %v348_v28  ;;  %v397_v47 = vrot.slane %v383_v44, %v2178_v8  ;;  %v398_v51 = vcombine.high %v390_v46, %v390_v46  ;;  %v505_v58 = vsel %vm455_vm0, %v390_v46, 0  ;;  %v417_v62 = vcombine.high %v286_v57, %v286_v57 }
  0x1a   : > { %639 = vmatpush1.bf16.msra.mxu0 %v469_v30  ;;  %670 = vmatprep.mubr.bf16.mxu0 %v2715_v3  ;;  %v414_v56 = vrot.slane %v400_v54, %v2178_v8  ;;  %v415_v59 = vcombine.high %v407_v55, %v407_v55  ;;  %v424_v63 = vrot.slane %v286_v57, %v2178_v8  ;;  %v517_v2 = vsel %vm455_vm0, %v407_v55, 0 }
  0x1b   : > { %2020 = vmatmul.mubr.msk.bf16.vlgmr.msra.gmra.mrb[0].mxu1 %vm451_vm1, %v2197_v26  ;;  %2025 = vmatprep.subr.msk.bf16.mxu0 %vm455_vm0, %v364_v31  ;;  %v399_v53 = vcombine.high %v397_v47, %v397_v47  ;;  %v511_v60 = vsel %vm455_vm0, %v397_v47, 0  ;;  %v431_v0 = vrot.slane %v417_v62, %v2178_v8  ;;  %v434_v7 = vcombine.high %v287_v1, %v287_v1  ;;  %v1692_v31 = vld [vmem:[%s2713_s6 + $0x38] sm:$0xff] }
  0x1c   : > { %682 = vmatpush1.bf16.msra.mxu1 %v475_v32  ;;  %713 = vmatprep.mubr.bf16.mxu1 %v2715_v3  ;;  %v416_v61 = vcombine.high %v414_v56, %v414_v56  ;;  %v432_v4 = vcombine.high %v424_v63, %v424_v63  ;;  %v523_v5 = vsel %vm455_vm0, %v414_v56, 0  ;;  %v441_v9 = vrot.slane %v287_v1, %v2178_v8 }
  0x1d   : > { %2027 = vmatprep.subr.msk.bf16.mxu1 %vm455_vm0, %v365_v33  ;;  %1715 = vperm.xlu0 %2082, %v1689_v45   ;;  %v433_v6 = vcombine.high %v431_v0, %v431_v0  ;;  %v448_v10 = vrot.slane %v434_v7, %v2178_v8  ;;  %v529_v11 = vsel %vm455_vm0, %v424_v63, 0  ;;  %v535_v13 = vsel %vm455_vm0, %v431_v0, 0 }
  0x1e   : > { %v449_v12 = vcombine.high %v441_v9, %v441_v9  ;;  %v541_v8 = vsel %vm455_vm0, %v441_v9, 0  ;;  %1375 = vperm.xlu1 %2083, %v1365_v17  }
  0x1f   : > { %v450_v14 = vcombine.high %v448_v10, %v448_v10  ;;  %v547_v15 = vsel %vm455_vm0, %v448_v10, 0 }
  0x21   : > { %2022 = vmatmul.mubr.msk.bf16.vlgmr.msra.gmra.mrb[4].mxu0 %vm451_vm1, %v2197_v26  ;;  %1725 = vperm.xlu0 %2082, %v1691_v49  }
  0x22   : > { %725 = vmatpush1.bf16.msra.mxu0 %v481_v40  ;;  %756 = vmatprep.mubr.bf16.mxu0 %v2715_v3 }
  0x23   : > { %2024 = vmatmul.mubr.msk.bf16.vlgmr.msra.gmra.mrb[4].mxu1 %vm451_vm1, %v2197_v26  ;;  %2029 = vmatprep.subr.msk.bf16.mxu0 %vm455_vm0, %v381_v41 }
  0x24   : > { %768 = vmatpush1.bf16.msra.mxu1 %v487_v42  ;;  %799 = vmatprep.mubr.bf16.mxu1 %v2715_v3 }
  0x25   : > { %2031 = vmatprep.subr.msk.bf16.mxu1 %vm455_vm0, %v382_v43  ;;  %1385 = vperm.xlu1 %2083, %v1367_v18  }
  0x29   : > { %2026 = vmatmul.mubr.msk.bf16.vlgmr.msra.gmra.mrb[8].mxu0 %vm451_vm1, %v2197_v26  ;;  %1700 = vperm.xlu1 %2083, %v1686_v19  }
  0x2a   : > { %811 = vmatpush1.bf16.msra.mxu0 %v493_v50  ;;  %842 = vmatprep.mubr.bf16.mxu0 %v2715_v3 }
  0x2b   : > { %2028 = vmatmul.mubr.msk.bf16.vlgmr.msra.gmra.mrb[8].mxu1 %vm451_vm1, %v2197_v26  ;;  %2033 = vmatprep.subr.msk.bf16.mxu0 %vm455_vm0, %v398_v51 }
  0x2c   : > { %854 = vmatpush1.bf16.msra.mxu1 %v499_v52  ;;  %885 = vmatprep.mubr.bf16.mxu1 %v2715_v3 }
  0x2d   : > { %2035 = vmatprep.subr.msk.bf16.mxu1 %vm455_vm0, %v399_v53  ;;  %1710 = vperm.xlu1 %2083, %v1688_v20  }
  0x31   : > { %2030 = vmatmul.mubr.msk.bf16.vlgmr.msra.gmra.mrb[12].mxu0 %vm451_vm1, %v2197_v26  ;;  %1720 = vperm.xlu1 %2083, %v1690_v24  }
  0x32   : > { %897 = vmatpush1.bf16.msra.mxu0 %v505_v58  ;;  %928 = vmatprep.mubr.bf16.mxu0 %v2715_v3 }
  0x33   : > { %2032 = vmatmul.mubr.msk.bf16.vlgmr.msra.gmra.mrb[12].mxu1 %vm451_vm1, %v2197_v26  ;;  %2037 = vmatprep.subr.msk.bf16.mxu0 %vm455_vm0, %v415_v59 }
  0x34   : > { %940 = vmatpush1.bf16.msra.mxu1 %v511_v60  ;;  %971 = vmatprep.mubr.bf16.mxu1 %v2715_v3 }
  0x35   : > { %2039 = vmatprep.subr.msk.bf16.mxu1 %vm455_vm0, %v416_v61  ;;  %1730 = vperm.xlu1 %2083, %v1692_v31  }
  0x39   : > { %2034 = vmatmul.mubr.msk.bf16.vlgmr.msra.gmra.mrb[16].mxu0 %vm451_vm1, %v2197_v26 }
  0x3a   : > { %983 = vmatpush1.bf16.msra.mxu0 %v517_v2  ;;  %1014 = vmatprep.mubr.bf16.mxu0 %v2715_v3 }
  0x3b   : > { %2036 = vmatmul.mubr.msk.bf16.vlgmr.msra.gmra.mrb[16].mxu1 %vm451_vm1, %v2197_v26  ;;  %2041 = vmatprep.subr.msk.bf16.mxu0 %vm455_vm0, %v432_v4 }
  0x3c   : > { %1026 = vmatpush1.bf16.msra.mxu1 %v523_v5  ;;  %1057 = vmatprep.mubr.bf16.mxu1 %v2715_v3 }
  0x3d   : > { %2043 = vmatprep.subr.msk.bf16.mxu1 %vm455_vm0, %v433_v6 }
  0x41   : > { %2038 = vmatmul.mubr.msk.bf16.vlgmr.msra.gmra.mrb[20].mxu0 %vm451_vm1, %v2197_v26 }
  0x42   : > { %1069 = vmatpush1.bf16.msra.mxu0 %v529_v11  ;;  %1100 = vmatprep.mubr.bf16.mxu0 %v2715_v3 }
  0x43   : > { %2040 = vmatmul.mubr.msk.bf16.vlgmr.msra.gmra.mrb[20].mxu1 %vm451_vm1, %v2197_v26  ;;  %2045 = vmatprep.subr.msk.bf16.mxu0 %vm455_vm0, %v449_v12 }
  0x44   : > { %1112 = vmatpush1.bf16.msra.mxu1 %v535_v13  ;;  %1143 = vmatprep.mubr.bf16.mxu1 %v2715_v3 }
  0x45   : > { %2047 = vmatprep.subr.msk.bf16.mxu1 %vm455_vm0, %v450_v14 }
  0x49   : > { %2042 = vmatmul.mubr.msk.bf16.vlgmr.msra.gmra.mrb[24].mxu0 %vm451_vm1, %v2197_v26 }
  0x4a   : > { %1155 = vmatpush1.bf16.msra.mxu0 %v541_v8  ;;  %1186 = vmatprep.mubr.bf16.mxu0 %v2715_v3 }
  0x4b   : > { %2044 = vmatmul.mubr.msk.bf16.vlgmr.msra.gmra.mrb[24].mxu1 %vm451_vm1, %v2197_v26 }
  0x4c   : > { %1198 = vmatpush1.bf16.msra.mxu1 %v547_v15  ;;  %1229 = vmatprep.mubr.bf16.mxu1 %v2715_v3 }
  0x51   : > { %2046 = vmatmul.mubr.msk.bf16.vlgmr.msra.gmra.mrb[28].mxu0 %vm451_vm1, %v2197_v26 }
  0x52   : > { %1543 = vmatprep.mubr.bf16.mxu0 %v2715_v3 }
  0x53   : > { %2048 = vmatmul.mubr.msk.bf16.vlgmr.msra.gmra.mrb[28].mxu1 %vm451_vm1, %v2197_v26 }
  0x54   : > { %1437 = vmatprep.mubr.bf16.mxu1 %v2715_v3 }
  0x87   : > { %v2319_v22 = vpop.permute.xlu0 %294 }
  0x8b   : > { %v2327_v33 = vpop.permute.xlu0 %299 }
  0xec   : > { %v586_v21 = vpop.f32.mrb[0].mxu0 }
  0xed   : > { %v588_v23 = vpop.f32.mrb[1].mxu0  ;;  %v587_v37 = vadd.f32 %v586_v21, %v2319_v22 }
  0xee   : > { %v590_v25 = vpop.f32.mrb[2].mxu0  ;;  %v629_v26 = vpop.f32.mrb[0].mxu1  ;;  %v589_v40 = vadd.f32 %v588_v23, %v2319_v22 }
  0xef   : > { %v592_v27 = vpop.f32.mrb[3].mxu0  ;;  %v631_v28 = vpop.f32.mrb[1].mxu1  ;;  %v591_v41 = vadd.f32 %v590_v25, %v2327_v33  ;;  %v630_v43 = vadd.f32 %v629_v26, %v2319_v22  ;;  %v1240_v50 = vmax.f32 %v587_v37, 0.0 }
  0xf0   : > { %v633_v29 = vpop.f32.mrb[2].mxu1  ;;  %v593_v42 = vadd.f32 %v592_v27, %v2327_v33  ;;  %v632_v45 = vadd.f32 %v631_v28, %v2319_v22  ;;  %v1241_v51 = vmax.f32 %v589_v40, 0.0 }
  0xf1   : > { %v635_v30 = vpop.f32.mrb[3].mxu1  ;;  %v634_v46 = vadd.f32 %v633_v29, %v2327_v33  ;;  %v1272_v52 = vmax.f32 %v591_v41, 0.0  ;;  %v1242_v54 = vmax.f32 %v630_v43, 0.0 }
  0xf2   : > { %v636_v47 = vadd.f32 %v635_v30, %v2327_v33  ;;  %v1273_v53 = vmax.f32 %v593_v42, 0.0  ;;  %v1243_v56 = vmax.f32 %v632_v45, 0.0 }
  0xf3   : > { %v1274_v57 = vmax.f32 %v634_v46, 0.0 }
  0xf4   : > { %v672_v32 = vpop.f32.mrb[4].mxu0  ;;  %v1275_v58 = vmax.f32 %v636_v47, 0.0 }
  0xf5   : > { %v674_v34 = vpop.f32.mrb[5].mxu0  ;;  %v2340_v49 = vadd.f32 %v672_v32, %v2319_v22 }
  0xf6   : > { %v676_v35 = vpop.f32.mrb[6].mxu0  ;;  %v715_v36 = vpop.f32.mrb[4].mxu1  ;;  %v675_v62 = vadd.f32 %v674_v34, %v2319_v22 }
  0xf7   : > { %v678_v38 = vpop.f32.mrb[7].mxu0  ;;  %v717_v39 = vpop.f32.mrb[5].mxu1  ;;  %v1244_v61 = vmax.f32 %v2340_v49, 0.0  ;;  %v2346_v63 = vadd.f32 %v676_v35, %v2327_v33  ;;  %v2350_v4 = vadd.f32 %v715_v36, %v2319_v22 }
  0xf8   : > { %v719_v44 = vpop.f32.mrb[6].mxu1  ;;  %v679_v11 = vadd.f32 %v678_v38, %v2327_v33  ;;  %v718_v25 = vadd.f32 %v717_v39, %v2319_v22  ;;  %v1245_v29 = vmax.f32 %v675_v62, 0.0 }
  0xf9   : > { %v2337_v48 = vpop.f32.mrb[7].mxu1  ;;  %v1276_v35 = vmax.f32 %v2346_v63, 0.0  ;;  %v1246_v36 = vmax.f32 %v2350_v4, 0.0  ;;  %v720_v41 = vadd.f32 %v719_v44, %v2327_v33 }
  0xfa   : > { %v1277_v40 = vmax.f32 %v679_v11, 0.0  ;;  %v1247_v47 = vmax.f32 %v718_v25, 0.0 }
  0xfc   : > { %v758_v55 = vpop.f32.mrb[8].mxu0 }
  0xfd   : > { %v759_v59 = vadd.f32 %v758_v55, %v2319_v22  ;;  %v760_v60 = vpop.f32.mrb[9].mxu0 }
  0xfe   : > { %v761_v0 = vadd.f32 %v760_v60, %v2319_v22  ;;  %v762_v1 = vpop.f32.mrb[10].mxu0  ;;  %v801_v2 = vpop.f32.mrb[8].mxu1 }
  0xff   : > { %v1248_v5 = vmax.f32 %v759_v59, 0.0  ;;  %v763_v6 = vadd.f32 %v762_v1, %v2327_v33  ;;  %v802_v7 = vadd.f32 %v801_v2, %v2319_v22  ;;  %v764_v9 = vpop.f32.mrb[11].mxu0  ;;  %v803_v10 = vpop.f32.mrb[9].mxu1 }
 0x100   : > { %v1249_v12 = vmax.f32 %v761_v0, 0.0  ;;  %v765_v13 = vadd.f32 %v764_v9, %v2327_v33  ;;  %v804_v14 = vadd.f32 %v803_v10, %v2319_v22  ;;  %v805_v8 = vpop.f32.mrb[10].mxu1 }
 0x101   : > { %v2357_v15 = vmax.f32 %v1240_v50, %v1248_v5  ;;  %v1280_v16 = vmax.f32 %v763_v6, 0.0  ;;  %v1250_v17 = vmax.f32 %v802_v7, 0.0  ;;  %v806_v18 = vadd.f32 %v805_v8, %v2327_v33  ;;  %v807_v19 = vpop.f32.mrb[11].mxu1 }
 0x102   : > { %v2360_v20 = vmax.f32 %v1241_v51, %v1249_v12  ;;  %v1281_v21 = vmax.f32 %v765_v13, 0.0  ;;  %v1251_v23 = vmax.f32 %v804_v14, 0.0  ;;  %v808_v24 = vadd.f32 %v807_v19, %v2327_v33 }
 0x103   : > { %v2364_v26 = vmax.f32 %v1272_v52, %v1280_v16  ;;  %v2366_v27 = vmax.f32 %v1242_v54, %v1250_v17  ;;  %v1282_v28 = vmax.f32 %v806_v18, 0.0  ;;  %v722_v54 = vadd.f32 %v2337_v48, %v2327_v33 }
 0x104   : > { %v2368_v30 = vmax.f32 %v1273_v53, %v1281_v21  ;;  %v2370_v31 = vmax.f32 %v1243_v56, %v1251_v23  ;;  %v1283_v32 = vmax.f32 %v808_v24, 0.0  ;;  %v844_v34 = vpop.f32.mrb[12].mxu0  ;;  %v1278_v48 = vmax.f32 %v720_v41, 0.0 }
 0x105   : > { %v2374_v37 = vmax.f32 %v1274_v57, %v1282_v28  ;;  %v845_v38 = vadd.f32 %v844_v34, %v2319_v22  ;;  %v846_v39 = vpop.f32.mrb[13].mxu0  ;;  %v1279_v9 = vmax.f32 %v722_v54, 0.0 }
 0x106   : > { %v2378_v42 = vmax.f32 %v1275_v58, %v1283_v32  ;;  %v847_v43 = vadd.f32 %v846_v39, %v2319_v22  ;;  %v848_v45 = vpop.f32.mrb[14].mxu0  ;;  %v887_v46 = vpop.f32.mrb[12].mxu1 }
 0x107   : > { %v1252_v49 = vmax.f32 %v845_v38, 0.0  ;;  %v849_v50 = vadd.f32 %v848_v45, %v2327_v33  ;;  %v888_v51 = vadd.f32 %v887_v46, %v2319_v22  ;;  %v850_v52 = vpop.f32.mrb[15].mxu0  ;;  %v889_v53 = vpop.f32.mrb[13].mxu1 }
 0x108   : > { %v1253_v55 = vmax.f32 %v847_v43, 0.0  ;;  %v851_v44 = vadd.f32 %v850_v52, %v2327_v33  ;;  %v890_v56 = vadd.f32 %v889_v53, %v2319_v22  ;;  %v891_v57 = vpop.f32.mrb[14].mxu1 }
 0x109   : > { %v2387_v58 = vmax.f32 %v1244_v61, %v1252_v49  ;;  %v1284_v59 = vmax.f32 %v849_v50, 0.0  ;;  %v1254_v60 = vmax.f32 %v888_v51, 0.0  ;;  %v892_v62 = vadd.f32 %v891_v57, %v2327_v33  ;;  %v893_v63 = vpop.f32.mrb[15].mxu1 }
 0x10a   : > { %v2390_v0 = vmax.f32 %v1245_v29, %v1253_v55  ;;  %v1285_v1 = vmax.f32 %v851_v44, 0.0  ;;  %v1255_v2 = vmax.f32 %v890_v56, 0.0  ;;  %v894_v4 = vadd.f32 %v893_v63, %v2327_v33 }
 0x10b   : > { %v2393_v5 = vmax.f32 %v1276_v35, %v1284_v59  ;;  %v2395_v6 = vmax.f32 %v1246_v36, %v1254_v60  ;;  %v1286_v7 = vmax.f32 %v892_v62, 0.0 }
 0x10c   : > { %v2397_v61 = vmax.f32 %v1277_v40, %v1285_v1  ;;  %v2399_v10 = vmax.f32 %v1247_v47, %v1255_v2  ;;  %v1287_v11 = vmax.f32 %v894_v4, 0.0  ;;  %v930_v12 = vpop.f32.mrb[16].mxu0 }
 0x10d   : > { %v2401_v13 = vmax.f32 %v1278_v48, %v1286_v7  ;;  %v932_v14 = vpop.f32.mrb[17].mxu0  ;;  %v931_v25 = vadd.f32 %v930_v12, %v2319_v22 }
 0x10e   : > { %v2403_v8 = vmax.f32 %v1279_v9, %v1287_v11  ;;  %v934_v16 = vpop.f32.mrb[18].mxu0  ;;  %v973_v17 = vpop.f32.mrb[16].mxu1  ;;  %v933_v29 = vadd.f32 %v932_v14, %v2319_v22 }
 0x10f   : > { %v936_v18 = vpop.f32.mrb[19].mxu0  ;;  %v975_v19 = vpop.f32.mrb[17].mxu1  ;;  %v935_v35 = vadd.f32 %v934_v16, %v2327_v33  ;;  %v974_v38 = vadd.f32 %v973_v17, %v2319_v22  ;;  %v1256_v47 = vmax.f32 %v931_v25, 0.0 }
 0x110   : > { %v977_v21 = vpop.f32.mrb[18].mxu1  ;;  %v2409_v36 = vadd.f32 %v936_v18, %v2327_v33  ;;  %v976_v41 = vadd.f32 %v975_v19, %v2319_v22  ;;  %v1257_v53 = vmax.f32 %v933_v29, 0.0 }
 0x111   : > { %v979_v23 = vpop.f32.mrb[19].mxu1  ;;  %v2414_v43 = vadd.f32 %v977_v21, %v2327_v33  ;;  %v1288_v56 = vmax.f32 %v935_v35, 0.0  ;;  %v1258_v59 = vmax.f32 %v974_v38, 0.0 }
 0x112   : > { %v2417_v45 = vadd.f32 %v979_v23, %v2327_v33  ;;  %v1289_v57 = vmax.f32 %v2409_v36, 0.0  ;;  %v1259_v62 = vmax.f32 %v976_v41, 0.0 }
 0x113   : > { %v1290_v63 = vmax.f32 %v2414_v43, 0.0 }
 0x114   : > { %v1016_v24 = vpop.f32.mrb[20].mxu0  ;;  %v1291_v1 = vmax.f32 %v2417_v45, 0.0 }
 0x115   : > { %v1018_v28 = vpop.f32.mrb[21].mxu0  ;;  %v2420_v49 = vadd.f32 %v1016_v24, %v2319_v22 }
 0x116   : > { %v1020_v32 = vpop.f32.mrb[22].mxu0  ;;  %v1059_v34 = vpop.f32.mrb[20].mxu1  ;;  %v2423_v50 = vadd.f32 %v1018_v28, %v2319_v22 }
 0x117   : > { %v1022_v39 = vpop.f32.mrb[23].mxu0  ;;  %v1061_v40 = vpop.f32.mrb[21].mxu1  ;;  %v2426_v51 = vadd.f32 %v1020_v32, %v2327_v33  ;;  %v2432_v55 = vadd.f32 %v1059_v34, %v2319_v22  ;;  %v1260_v48 = vmax.f32 %v2420_v49, 0.0 }
 0x118   : > { %v1063_v46 = vpop.f32.mrb[22].mxu1  ;;  %v2429_v54 = vadd.f32 %v1022_v39, %v2327_v33  ;;  %v2435_v44 = vadd.f32 %v1061_v40, %v2319_v22  ;;  %v1261_v7 = vmax.f32 %v2423_v50, 0.0 }
 0x119   : > { %v1065_v52 = vpop.f32.mrb[23].mxu1  ;;  %v2439_v60 = vadd.f32 %v1063_v46, %v2327_v33  ;;  %v1292_v9 = vmax.f32 %v2426_v51, 0.0  ;;  %v1262_v16 = vmax.f32 %v2432_v55, 0.0 }
 0x11a   : > { %v2444_v2 = vadd.f32 %v1065_v52, %v2327_v33  ;;  %v1293_v14 = vmax.f32 %v2429_v54, 0.0  ;;  %v1263_v17 = vmax.f32 %v2435_v44, 0.0 }
 0x11b   : > { %v1294_v23 = vmax.f32 %v2439_v60, 0.0 }
 0x11c   : > { %v1102_v4 = vpop.f32.mrb[24].mxu0 }
 0x11d   : > { %v1103_v11 = vadd.f32 %v1102_v4, %v2319_v22  ;;  %v1104_v12 = vpop.f32.mrb[25].mxu0 }
 0x11e   : > { %v1105_v18 = vadd.f32 %v1104_v12, %v2319_v22  ;;  %v1106_v19 = vpop.f32.mrb[26].mxu0  ;;  %v1145_v21 = vpop.f32.mrb[24].mxu1 }
 0x11f   : > { %v1264_v24 = vmax.f32 %v1103_v11, 0.0  ;;  %v1107_v25 = vadd.f32 %v1106_v19, %v2327_v33  ;;  %v1146_v28 = vadd.f32 %v1145_v21, %v2319_v22  ;;  %v1108_v29 = vpop.f32.mrb[27].mxu0  ;;  %v1147_v32 = vpop.f32.mrb[25].mxu1 }
 0x120   : > { %v1265_v35 = vmax.f32 %v1105_v18, 0.0  ;;  %v1109_v36 = vadd.f32 %v1108_v29, %v2327_v33  ;;  %v1148_v38 = vadd.f32 %v1147_v32, %v2319_v22  ;;  %v1149_v39 = vpop.f32.mrb[26].mxu1 }
 0x121   : > { %v1320_v40 = vmax.f32 %v1256_v47, %v1264_v24  ;;  %v1296_v41 = vmax.f32 %v1107_v25, 0.0  ;;  %v1266_v43 = vmax.f32 %v1146_v28, 0.0  ;;  %v1150_v45 = vadd.f32 %v1149_v39, %v2327_v33  ;;  %v1151_v46 = vpop.f32.mrb[27].mxu1 }
 0x122   : > { %v1321_v52 = vmax.f32 %v1257_v53, %v1265_v35  ;;  %v1297_v4 = vmax.f32 %v1109_v36, 0.0  ;;  %v1267_v11 = vmax.f32 %v1148_v38, 0.0  ;;  %v1152_v12 = vadd.f32 %v1151_v46, %v2327_v33 }
 0x123   : > { %v1336_v19 = vmax.f32 %v2357_v15, %v1320_v40  ;;  %v1328_v21 = vmax.f32 %v1288_v56, %v1296_v41  ;;  %v1322_v18 = vmax.f32 %v1258_v59, %v1266_v43  ;;  %v1298_v3 = vmax.f32 %v1150_v45, 0.0 }
 0x124   : > { %v1337_v29 = vmax.f32 %v2360_v20, %v1321_v52  ;;  %v1329_v32 = vmax.f32 %v1289_v57, %v1297_v4  ;;  %v1323_v34 = vmax.f32 %v1259_v62, %v1267_v11  ;;  %v1299_v47 = vmax.f32 %v1152_v12, 0.0  ;;  %v1188_v24 = vpop.f32.mrb[28].mxu0 }
 0x125   : > { %v1344_v25 = vmax.f32 %v2364_v26, %v1328_v21  ;;  %v1338_v28 = vmax.f32 %v2366_v27, %v1322_v18  ;;  %v1330_v53 = vmax.f32 %v1290_v63, %v1298_v3  ;;  %v1189_v35 = vadd.f32 %v1188_v24, %v2319_v22  ;;  %v1190_v36 = vpop.f32.mrb[29].mxu0 }
 0x126   : > { %v1345_v38 = vmax.f32 %v2368_v30, %v1329_v32  ;;  %v1339_v15 = vmax.f32 %v2370_v31, %v1323_v34  ;;  %v1331_v56 = vmax.f32 %v1291_v1, %v1299_v47  ;;  %v1191_v59 = vadd.f32 %v1190_v36, %v2319_v22  ;;  %v1192_v20 = vpop.f32.mrb[30].mxu0  ;;  %v1231_v57 = vpop.f32.mrb[28].mxu1 }
 0x127   : > { %v1352_v62 = vpack.c.bf16 %v1344_v25, %v1336_v19  ;;  %v1346_v39 = vmax.f32 %v2374_v37, %v1330_v53  ;;  %v1268_v40 = vmax.f32 %v1189_v35, 0.0  ;;  %v1193_v26 = vadd.f32 %v1192_v20, %v2327_v33  ;;  %v1194_v27 = vpop.f32.mrb[31].mxu0  ;;  %v1233_v3 = vpop.f32.mrb[29].mxu1 }
 0x128   : > { %v1347_v63 = vmax.f32 %v2378_v42, %v1331_v56  ;;  %v1269_v41 = vmax.f32 %v1191_v59, 0.0  ;;  %v1232_v30 = vadd.f32 %v1231_v57, %v2319_v22  ;;  %v1195_v31 = vadd.f32 %v1194_v27, %v2327_v33  ;;  %v1235_v1 = vpop.f32.mrb[30].mxu1  ;;  %v2527_v35 = vpop.permute.xlu1 %1370 }
 0x129   : > { %v1354_v34 = vpack.c.bf16 %v1346_v39, %v1338_v28  ;;  %v1324_v43 = vmax.f32 %v1260_v48, %v1268_v40  ;;  %v1300_v45 = vmax.f32 %v1193_v26, 0.0  ;;  %v1234_v37 = vadd.f32 %v1233_v3, %v2319_v22  ;;  %v1237_v46 = vpop.f32.mrb[31].mxu1 }
 0x12a   : > { %v1325_v52 = vmax.f32 %v1261_v7, %v1269_v41  ;;  %v1270_v4 = vmax.f32 %v1232_v30, 0.0  ;;  %v1301_v11 = vmax.f32 %v1195_v31, 0.0  ;;  %v1236_v42 = vadd.f32 %v1235_v1, %v2327_v33 }
 0x12b   : > { %v1340_v12 = vmax.f32 %v2387_v58, %v1324_v43  ;;  %v1332_v19 = vmax.f32 %v1292_v9, %v1300_v45  ;;  %v1271_v21 = vmax.f32 %v1234_v37, 0.0  ;;  %v1238_v49 = vadd.f32 %v1237_v46, %v2327_v33 }
 0x12c   : > { %v1341_v48 = vmax.f32 %v2390_v0, %v1325_v52  ;;  %v1326_v22 = vmax.f32 %v1262_v16, %v1270_v4  ;;  %v1333_v50 = vmax.f32 %v1293_v14, %v1301_v11  ;;  %v1302_v7 = vmax.f32 %v1236_v42, 0.0 }
 0x12d   : > { %v1348_v18 = vmax.f32 %v2393_v5, %v1332_v19  ;;  %v1327_v58 = vmax.f32 %v1263_v17, %v1271_v21  ;;  %v1303_v32 = vmax.f32 %v1238_v49, 0.0  ;;  %v1353_v51 = vpack.c.bf16 %v1345_v38, %v1337_v29  ;;  %v2093_v5 = vld [vmem:[%s2710_s3] sm:$0xff]   ;;  %v2549_v19 = vpop.permute.xlu0 %1380 }
 0x12e   : > { %v1342_v9 = vmax.f32 %v2395_v6, %v1326_v22  ;;  %v1349_v33 = vmax.f32 %v2397_v61, %v1333_v50  ;;  %v1334_v0 = vmax.f32 %v1294_v23, %v1302_v7  ;;  %v1355_v55 = vpack.c.bf16 %v1347_v63, %v1339_v15 }
 0x12f   : > { %v1356_v16 = vpack.c.bf16 %v1348_v18, %v1340_v12  ;;  %v1343_v54 = vmax.f32 %v2399_v10, %v1327_v58  ;;  %v2717_v14 = vmax.f32 %v2444_v2, 0.0  ;;  %1405 = vmatprep.subr.bf16.mxu1 %v1353_v51  ;;  %v2718_v2 = vmov 0  }
 0x130   : > { %v1350_v44 = vmax.f32 %v2401_v13, %v1334_v0  ;;  %1406 = vmatpush1.bf16.msra.mxu1 %v1352_v62  ;;  %v1357_v6 = vpack.c.bf16 %v1349_v33, %v1341_v48  ;;  %v2094_v13 = vld [vmem:[%s2710_s3 + $0x8] sm:$0xff]   ;;  %v2535_v62 = vpop.permute.xlu1 %1375 }
 0x131   : > { %v1335_v47 = vmax.f32 %v2717_v14, %v1303_v32  ;;  %1458 = vmatprep.subr.bf16.mxu1 %v1355_v55 }
 0x132   : > { %v1358_v60 = vpack.c.bf16 %v1350_v44, %v1342_v9  ;;  %1511 = vmatprep.subr.bf16.mxu0 %v1357_v6 }
 0x133   : > { %v1351_v61 = vmax.f32 %v2403_v8, %v1335_v47  ;;  %2051 = vmatmul.mubr.msk.bf16.vlgmr.msra.gmra.mrb[32].mxu1 %vm1398_vm2, %v2093_v5  ;;  %1512 = vmatpush1.bf16.msra.mxu0 %v1356_v16 }
 0x134   : > { %1459 = vmatpush1.bf16.msra.mxu1 %v1354_v34  ;;  %1447 = vmatprep.mubr.bf16.mxu1 %v2718_v2  ;;  %v2551_v49 = vpop.permute.xlu1 %1385 }
 0x135   : > { %v1359_v10 = vpack.c.bf16 %v1351_v61, %v1343_v54 }
 0x136   : > { %2055 = vmatmul.mubr.msk.bf16.vlgmr.msra.gmra.mrb[32].mxu0 %vm1398_vm2, %v2093_v5 }
 0x137   : > { %1564 = vmatprep.subr.bf16.mxu1 %v1359_v10  ;;  %1553 = vmatprep.mubr.bf16.mxu0 %v2718_v2 }
 0x13b   : > { %2052 = vmatmul.mubr.msk.bf16.gmra.mrb[36].mxu1 %vm1398_vm2, %v2094_v13 }
 0x13c   : > { %1490 = vmatprep.mubr.bf16.mxu1 %v2718_v2 }
 0x13e   : > { %2056 = vmatmul.mubr.msk.bf16.gmra.mrb[36].mxu0 %vm1398_vm2, %v2094_v13 }
 0x13f   : > { %1798 = vmatprep.mubr.bf16.mxu0 %v2718_v2 }
 0x143   : > { %2053 = vmatmul.mubr.msk.bf16.vlgmr.msra.gmra.mrb[40].mxu1 %vm1398_vm2, %v2093_v5 }
 0x144   : > { %1565 = vmatpush1.bf16.msra.mxu1 %v1358_v60  ;;  %1500 = vmatprep.mubr.bf16.mxu1 %v2718_v2 }
 0x14b   : > { %2054 = vmatmul.mubr.msk.bf16.gmra.mrb[44].mxu1 %vm1398_vm2, %v2094_v13 }
 0x14c   : > { %1596 = vmatprep.mubr.bf16.mxu1 %v2718_v2 }
 0x153   : > { %2057 = vmatmul.mubr.msk.bf16.vlgmr.msra.gmra.mrb[48].mxu1 %vm1398_vm2, %v2093_v5 }
 0x154   : > { %1606 = vmatprep.mubr.bf16.mxu1 %v2718_v2 }
 0x15b   : > { %2058 = vmatmul.mubr.msk.bf16.gmra.mrb[52].mxu1 %vm1398_vm2, %v2094_v13 }
 0x206   : > { %v1439_v8 = vpop.f32.mrb[32].mxu1 }
 0x207   : > { %v1441_v17 = vpop.f32.mrb[33].mxu1  ;;  %v1440_v40 = vadd.f32 %v1439_v8, %v2527_v35 }
 0x208   : > { %v1443_v23 = vpop.f32.mrb[34].mxu1  ;;  %v1442_v26 = vadd.f32 %v1441_v17, %v2527_v35 }
 0x209   : > { %v1445_v29 = vpop.f32.mrb[35].mxu1  ;;  %v1545_v24 = vpop.f32.mrb[32].mxu0  ;;  %v1444_v3 = vadd.f32 %v1443_v23, %v2535_v62  ;;  %v1617_v34 = vmax.f32 %v1440_v40, 0.0 }
 0x20a   : > { %v1547_v25 = vpop.f32.mrb[33].mxu0  ;;  %v1446_v30 = vadd.f32 %v1445_v29, %v2535_v62  ;;  %v1618_v46 = vmax.f32 %v1442_v26, 0.0  ;;  %v1546_v10 = vadd.f32 %v1545_v24, %v2527_v35 }
 0x20b   : > { %v2523_v28 = vpop.f32.mrb[34].mxu0  ;;  %v1625_v11 = vmax.f32 %v1444_v3, 0.0  ;;  %v1548_v23 = vadd.f32 %v1547_v25, %v2527_v35 }
 0x20c   : > { %v2525_v53 = vpop.f32.mrb[35].mxu0  ;;  %v1626_v21 = vmax.f32 %v1446_v30, 0.0  ;;  %v1621_v40 = vmax.f32 %v1546_v10, 0.0  ;;  %v1550_v26 = vadd.f32 %v2523_v28, %v2535_v62 }
 0x20d   : > { %v1622_v24 = vmax.f32 %v1548_v23, 0.0 }
 0x20e   : > { %v1449_v36 = vpop.f32.mrb[36].mxu1 }
 0x20f   : > { %v1451_v38 = vpop.f32.mrb[37].mxu1  ;;  %v1450_v50 = vadd.f32 %v1449_v36, %v2549_v19 }
 0x210   : > { %v1453_v15 = vpop.f32.mrb[38].mxu1  ;;  %v1452_v18 = vadd.f32 %v1451_v38, %v2549_v19 }
 0x211   : > { %v1455_v56 = vpop.f32.mrb[39].mxu1  ;;  %v2529_v59 = vpop.f32.mrb[36].mxu0  ;;  %v1454_v51 = vadd.f32 %v1453_v15, %v2551_v49  ;;  %v1633_v54 = vmax.f32 %v1450_v50, 0.0 }
 0x212   : > { %v2531_v20 = vpop.f32.mrb[37].mxu0  ;;  %v1456_v0 = vadd.f32 %v1455_v56, %v2551_v49  ;;  %v1634_v44 = vmax.f32 %v1452_v18, 0.0 }
 0x213   : > { %v2533_v57 = vpop.f32.mrb[38].mxu0  ;;  %v1641_v60 = vmax.f32 %v1454_v51, 0.0 }
 0x214   : > { %v2537_v39 = vpop.f32.mrb[39].mxu0  ;;  %v1642_v17 = vmax.f32 %v1456_v0, 0.0 }
 0x216   : > { %v1492_v27 = vpop.f32.mrb[40].mxu1 }
 0x217   : > { %v1493_v63 = vadd.f32 %v1492_v27, %v2527_v35  ;;  %v1494_v41 = vpop.f32.mrb[41].mxu1 }
 0x218   : > { %v1495_v31 = vadd.f32 %v1494_v41, %v2527_v35  ;;  %v1496_v1 = vpop.f32.mrb[42].mxu1 }
 0x219   : > { %v1619_v43 = vmax.f32 %v1493_v63, 0.0  ;;  %v1497_v45 = vadd.f32 %v1496_v1, %v2535_v62  ;;  %v1498_v37 = vpop.f32.mrb[43].mxu1  ;;  %v1552_v63 = vadd.f32 %v2525_v53, %v2535_v62 }
 0x21a   : > { %v1620_v52 = vmax.f32 %v1495_v31, 0.0  ;;  %v1499_v4 = vadd.f32 %v1498_v37, %v2535_v62 }
 0x21b   : > { %v2547_v42 = vmax.f32 %v1617_v34, %v1619_v43  ;;  %v1627_v12 = vmax.f32 %v1497_v45, 0.0  ;;  %v1629_v45 = vmax.f32 %v1550_v26, 0.0 }
 0x21c   : > { %v2553_v48 = vmax.f32 %v1618_v46, %v1620_v52  ;;  %v1628_v22 = vmax.f32 %v1499_v4, 0.0  ;;  %v1630_v46 = vmax.f32 %v1552_v63, 0.0 }
 0x21d   : > { %v2556_v7 = vmax.f32 %v1625_v11, %v1627_v12  ;;  %v1556_v11 = vadd.f32 %v2529_v59, %v2549_v19  ;;  %v1558_v12 = vadd.f32 %v2531_v20, %v2549_v19  ;;  %v1562_v59 = vadd.f32 %v2537_v39, %v2551_v49 }
 0x21e   : > { %v2559_v58 = vmax.f32 %v1626_v21, %v1628_v22  ;;  %v1502_v32 = vpop.f32.mrb[44].mxu1 }
 0x21f   : > { %v1503_v9 = vadd.f32 %v1502_v32, %v2549_v19  ;;  %v1504_v33 = vpop.f32.mrb[45].mxu1  ;;  %v1646_v39 = vmax.f32 %v1562_v59, 0.0 }
 0x220   : > { %v1505_v55 = vadd.f32 %v1504_v33, %v2549_v19  ;;  %v1506_v16 = vpop.f32.mrb[46].mxu1  ;;  %v1637_v33 = vmax.f32 %v1556_v11, 0.0 }
 0x221   : > { %v1635_v14 = vmax.f32 %v1503_v9, 0.0  ;;  %v1507_v47 = vadd.f32 %v1506_v16, %v2551_v49  ;;  %v1508_v5 = vpop.f32.mrb[47].mxu1 }
 0x222   : > { %v1636_v6 = vmax.f32 %v1505_v55, 0.0  ;;  %v1509_v61 = vadd.f32 %v1508_v5, %v2551_v49 }
 0x223   : > { %v2568_v13 = vmax.f32 %v1633_v54, %v1635_v14  ;;  %v1643_v8 = vmax.f32 %v1507_v47, 0.0 }
 0x224   : > { %v2571_v29 = vmax.f32 %v1634_v44, %v1636_v6  ;;  %v1644_v36 = vmax.f32 %v1509_v61, 0.0 }
 0x225   : > { %v1655_v38 = vmax.f32 %v1641_v60, %v1643_v8 }
 0x226   : > { %v1656_v15 = vmax.f32 %v1642_v17, %v1644_v36  ;;  %v1598_v56 = vpop.f32.mrb[48].mxu1 }
 0x227   : > { %v1599_v27 = vadd.f32 %v1598_v56, %v2527_v35  ;;  %v1600_v3 = vpop.f32.mrb[49].mxu1 }
 0x228   : > { %v1601_v41 = vadd.f32 %v1600_v3, %v2527_v35  ;;  %v1602_v25 = vpop.f32.mrb[50].mxu1 }
 0x229   : > { %v1623_v30 = vmax.f32 %v1599_v27, 0.0  ;;  %v1603_v31 = vadd.f32 %v1602_v25, %v2535_v62  ;;  %v1604_v1 = vpop.f32.mrb[51].mxu1  ;;  %v1701_v27 = vpop.permute.xlu1 %1700 }
 0x22a   : > { %v1624_v34 = vmax.f32 %v1601_v41, 0.0  ;;  %v1605_v43 = vadd.f32 %v1604_v1, %v2535_v62  ;;  %v1560_v62 = vadd.f32 %v2533_v57, %v2551_v49  ;;  %v1638_v57 = vmax.f32 %v1558_v12, 0.0 }
 0x22b   : > { %v1657_v37 = vmax.f32 %v1621_v40, %v1623_v30  ;;  %v1631_v28 = vmax.f32 %v1603_v31, 0.0 }
 0x22c   : > { %v1658_v52 = vmax.f32 %v1622_v24, %v1624_v34  ;;  %v1632_v4 = vmax.f32 %v1605_v43, 0.0  ;;  %v1645_v47 = vmax.f32 %v1560_v62, 0.0 }
 0x22d   : > { %v1665_v53 = vmax.f32 %v2547_v42, %v1657_v37  ;;  %v1659_v35 = vmax.f32 %v1629_v45, %v1631_v28  ;;  %v1711_v28 = vpop.permute.xlu1 %1710 }
 0x22e   : > { %v1666_v21 = vmax.f32 %v2553_v48, %v1658_v52  ;;  %v1660_v22 = vmax.f32 %v1630_v46, %v1632_v4  ;;  %v1608_v50 = vpop.f32.mrb[52].mxu1 }
 0x22f   : > { %v1667_v18 = vmax.f32 %v2556_v7, %v1659_v35  ;;  %v1609_v32 = vadd.f32 %v1608_v50, %v2549_v19  ;;  %v1610_v51 = vpop.f32.mrb[53].mxu1 }
 0x230   : > { %v1668_v42 = vmax.f32 %v2559_v58, %v1660_v22  ;;  %v1611_v9 = vadd.f32 %v1610_v51, %v2549_v19  ;;  %v1612_v20 = vpop.f32.mrb[54].mxu1 }
 0x231   : > { %v1673_v48 = vpack.c.bf16 %v1667_v18, %v1665_v53  ;;  %v1639_v0 = vmax.f32 %v1609_v32, 0.0  ;;  %v1613_v55 = vadd.f32 %v1612_v20, %v2551_v49  ;;  %v1614_v16 = vpop.f32.mrb[55].mxu1  ;;  %v1721_v51 = vpop.permute.xlu1 %1720 }
 0x232   : > { %v1640_v54 = vmax.f32 %v1611_v9, 0.0  ;;  %v1615_v7 = vadd.f32 %v1614_v16, %v2551_v49  ;;  %v1674_v14 = vpack.c.bf16 %v1668_v42, %v1666_v21  ;;  %v2095_v49 = vld [vmem:[%s2712_s5] sm:$0xff]  }
 0x233   : > { %v1661_v5 = vmax.f32 %v1637_v33, %v1639_v0  ;;  %v1647_v44 = vmax.f32 %v1613_v55, 0.0 }
 0x234   : > { %v1662_v6 = vmax.f32 %v1638_v57, %v1640_v54  ;;  %v1648_v58 = vmax.f32 %v1615_v7, 0.0  ;;  %1766 = vmatprep.subr.bf16.mxu0 %v1674_v14 }
 0x235   : > { %v1669_v19 = vmax.f32 %v2568_v13, %v1661_v5  ;;  %v1663_v61 = vmax.f32 %v1645_v47, %v1647_v44  ;;  %1767 = vmatpush1.bf16.msra.mxu0 %v1673_v48  ;;  %v2096_v13 = vld [vmem:[%s2712_s5 + $0x8] sm:$0xff]   ;;  %v1731_v47 = vpop.permute.xlu1 %1730 }
 0x236   : > { %v1670_v60 = vmax.f32 %v2571_v29, %v1662_v6  ;;  %v1664_v10 = vmax.f32 %v1646_v39, %v1648_v58  ;;  %v2097_v29 = vld [vmem:[%s2712_s5 + $0x10] sm:$0xff]  }
 0x237   : > { %v1671_v8 = vmax.f32 %v1655_v38, %v1663_v61  ;;  %v2098_v38 = vld [vmem:[%s2712_s5 + $0x18] sm:$0xff]  }
 0x238   : > { %v1672_v17 = vmax.f32 %v1656_v15, %v1664_v10  ;;  %v1696_v15 = vpop.permute.xlu0 %1695 }
 0x239   : > { %v1675_v23 = vpack.c.bf16 %v1671_v8, %v1669_v19 }
 0x23a   : > { %v1676_v36 = vpack.c.bf16 %v1672_v17, %v1670_v60 }
 0x23c   : > { %1768 = vmatprep.subr.bf16.mxu0 %v1676_v36  ;;  %v1706_v1 = vpop.permute.xlu0 %1705 }
 0x23d   : > { %1769 = vmatpush1.bf16.msra.mxu0 %v1675_v23 }
 0x240   : > { %2063 = vmatmul.mubr.msk.bf16.vlgmr.msra.gmra.mrb[40].mxu0 %vm1753_vm3, %v2095_v49  ;;  %v1716_v22 = vpop.permute.xlu0 %1715 }
 0x241   : > { %1808 = vmatprep.mubr.bf16.mxu0 %v2718_v2 }
 0x244   : > { %v1726_v16 = vpop.permute.xlu0 %1725 }
 0x248   : > { %2064 = vmatmul.mubr.msk.bf16.gmra.mrb[44].mxu0 %vm1753_vm3, %v2096_v13 }
 0x249   : > { %1818 = vmatprep.mubr.bf16.mxu0 %v2718_v2 }
 0x250   : > { %2065 = vmatmul.mubr.msk.bf16.gmra.mrb[48].mxu0 %vm1753_vm3, %v2097_v29 }
 0x251   : > { %1828 = vmatprep.mubr.bf16.mxu0 %v2718_v2 }
 0x258   : > { %2066 = vmatmul.mubr.msk.bf16.gmra.mrb[52].mxu0 %vm1753_vm3, %v2098_v38 }
 0x313   : > { %v1800_v56 = vpop.f32.mrb[40].mxu0 }
 0x314   : > { %v2614_v40 = vadd.f32 %v1800_v56, %v1696_v15  ;;  %v1802_v26 = vpop.f32.mrb[41].mxu0 }
 0x315   : > { %v1804_v3 = vpop.f32.mrb[42].mxu0  ;;  %v2617_v63 = vadd.f32 %v1802_v26, %v1696_v15 }
 0x316   : > { %v1839_v24 = vmax.f32 %v2614_v40, 0.0  ;;  %v2619_v41 = vadd.f32 %v1804_v3, %v1701_v27  ;;  %v1806_v25 = vpop.f32.mrb[43].mxu0 }
 0x317   : > { %v2622_v30 = vadd.f32 %v1806_v25, %v1701_v27  ;;  %v1840_v31 = vmax.f32 %v2617_v63, 0.0 }
 0x318   : > { %v1841_v2 = vmax.f32 %v2619_v41, 0.0  ;;  %1863 = vrot.lane.b32.xlu0 %v1839_v24, %s2109_s9 }
 0x319   : > { %v1842_v43 = vmax.f32 %v2622_v30, 0.0 }
 0x31a   : > { %1865 = vrot.lane.b32.xlu1 %v1841_v2, %s2109_s9 }
 0x31b   : > { %v1810_v34 = vpop.f32.mrb[44].mxu0 }
 0x31c   : > { %v2632_v45 = vadd.f32 %v1810_v34, %v1706_v1  ;;  %v1812_v37 = vpop.f32.mrb[45].mxu0  ;;  %1903 = vrot.lane.b32.xlu0 %v1840_v31, %s2109_s9 }
 0x31d   : > { %v1814_v46 = vpop.f32.mrb[46].mxu0  ;;  %v2638_v4 = vadd.f32 %v1812_v37, %v1706_v1 }
 0x31e   : > { %v1843_v52 = vmax.f32 %v2632_v45, 0.0  ;;  %v2640_v11 = vadd.f32 %v1814_v46, %v1711_v28  ;;  %v1816_v53 = vpop.f32.mrb[47].mxu0  ;;  %1905 = vrot.lane.b32.xlu1 %v1842_v43, %s2109_s9 }
 0x31f   : > { %v2646_v12 = vadd.f32 %v1816_v53, %v1711_v28  ;;  %v1844_v21 = vmax.f32 %v2638_v4, 0.0 }
 0x320   : > { %v1845_v35 = vmax.f32 %v2640_v11, 0.0  ;;  %1867 = vrot.lane.b32.xlu0 %v1843_v52, %s2109_s9 }
 0x321   : > { %v1846_v62 = vmax.f32 %v2646_v12, 0.0 }
 0x322   : > { %1869 = vrot.lane.b32.xlu1 %v1845_v35, %s2109_s9 }
 0x323   : > { %v1820_v50 = vpop.f32.mrb[48].mxu0 }
 0x324   : > { %v2656_v18 = vadd.f32 %v1820_v50, %v1716_v22  ;;  %v1822_v32 = vpop.f32.mrb[49].mxu0  ;;  %1907 = vrot.lane.b32.xlu0 %v1844_v21, %s2109_s9 }
 0x325   : > { %v1824_v59 = vpop.f32.mrb[50].mxu0  ;;  %v1823_v9 = vadd.f32 %v1822_v32, %v1716_v22 }
 0x326   : > { %v1847_v42 = vmax.f32 %v2656_v18, 0.0  ;;  %v1825_v20 = vadd.f32 %v1824_v59, %v1721_v51  ;;  %v1826_v33 = vpop.f32.mrb[51].mxu0  ;;  %1909 = vrot.lane.b32.xlu1 %v1846_v62, %s2109_s9 }
 0x327   : > { %v1827_v0 = vadd.f32 %v1826_v33, %v1721_v51  ;;  %v1848_v55 = vmax.f32 %v1823_v9, 0.0 }
 0x328   : > { %v1849_v48 = vmax.f32 %v1825_v20, 0.0  ;;  %1871 = vrot.lane.b32.xlu0 %v1847_v42, %s2109_s9 }
 0x329   : > { %v1850_v54 = vmax.f32 %v1827_v0, 0.0 }
 0x32a   : > { %1873 = vrot.lane.b32.xlu1 %v1849_v48, %s2109_s9 }
 0x32b   : > { %v1830_v57 = vpop.f32.mrb[52].mxu0 }
 0x32c   : > { %v1831_v7 = vadd.f32 %v1830_v57, %v1726_v16  ;;  %v1832_v14 = vpop.f32.mrb[53].mxu0  ;;  %1911 = vrot.lane.b32.xlu0 %v1848_v55, %s2109_s9 }
 0x32d   : > { %v1834_v5 = vpop.f32.mrb[54].mxu0  ;;  %v1833_v39 = vadd.f32 %v1832_v14, %v1726_v16 }
 0x32e   : > { %v1851_v44 = vmax.f32 %v1831_v7, 0.0  ;;  %v1835_v6 = vadd.f32 %v1834_v5, %v1731_v47  ;;  %v1836_v58 = vpop.f32.mrb[55].mxu0  ;;  %1913 = vrot.lane.b32.xlu1 %v1850_v54, %s2109_s9 }
 0x32f   : > { %v1837_v61 = vadd.f32 %v1836_v58, %v1731_v47  ;;  %v1852_v60 = vmax.f32 %v1833_v39, 0.0 }
 0x330   : > { %v1853_v19 = vmax.f32 %v1835_v6, 0.0  ;;  %1875 = vrot.lane.b32.xlu0 %v1851_v44, %s2109_s9 }
 0x331   : > { %v1854_v10 = vmax.f32 %v1837_v61, 0.0 }
 0x332   : > { %1877 = vrot.lane.b32.xlu1 %v1853_v19, %s2109_s9 }
 0x334   : > { %1915 = vrot.lane.b32.xlu0 %v1852_v60, %s2109_s9 }
 0x336   : > { %1917 = vrot.lane.b32.xlu1 %v1854_v10, %s2109_s9 }
 0x38a   : > { %v1864_v8 = vpop.permute.xlu0 %1863 }
 0x38b   : > { %v1887_v36 = vmax.f32 %v1839_v24, %v1864_v8 }
 0x38c   : > { %v1866_v17 = vpop.permute.xlu1 %1865 }
 0x38d   : > { %v1888_v29 = vmax.f32 %v1841_v2, %v1866_v17 }
 0x38e   : > { %v1904_v23 = vpop.permute.xlu0 %1903 }
 0x38f   : > { %v1927_v49 = vmax.f32 %v1840_v31, %v1904_v23 }
 0x390   : > { %v1906_v13 = vpop.permute.xlu1 %1905 }
 0x391   : > { %v1935_v38 = vmax.f32 %v1887_v36, %v1927_v49  ;;  %v1928_v15 = vmax.f32 %v1842_v43, %v1906_v13 }
 0x392   : > { %v1868_v56 = vpop.permute.xlu0 %1867 }
 0x393   : > { %1944 = vst.msk [vmem:[%s2678_s12] sm:$0xff] %vm1943_vm4, %v1935_v38  ;;  %v1936_v40 = vmax.f32 %v1888_v29, %v1928_v15  ;;  %v1889_v3 = vmax.f32 %v1843_v52, %v1868_v56 }
 0x394   : > { %v1870_v26 = vpop.permute.xlu1 %1869 }
 0x395   : > { %1945 = vst.msk [vmem:[%s2678_s12 + $0x8] sm:$0xff] %vm1943_vm4, %v1936_v40  ;;  %v1890_v41 = vmax.f32 %v1845_v35, %v1870_v26 }
 0x396   : > { %v1908_v27 = vpop.permute.xlu0 %1907 }
 0x397   : > { %v1929_v24 = vmax.f32 %v1844_v21, %v1908_v27 }
 0x398   : > { %v1910_v63 = vpop.permute.xlu1 %1909 }
 0x399   : > { %v1937_v25 = vmax.f32 %v1889_v3, %v1929_v24  ;;  %v1930_v2 = vmax.f32 %v1846_v62, %v1910_v63 }
 0x39a   : > { %v1872_v30 = vpop.permute.xlu0 %1871 }
 0x39b   : > { %1946 = vst.msk [vmem:[%s2678_s12 + $0x10] sm:$0xff] %vm1943_vm4, %v1937_v25  ;;  %v1938_v31 = vmax.f32 %v1890_v41, %v1930_v2  ;;  %v1891_v43 = vmax.f32 %v1847_v42, %v1872_v30 }
 0x39c   : > { %v1874_v1 = vpop.permute.xlu1 %1873 }
 0x39d   : > { %1947 = vst.msk [vmem:[%s2678_s12 + $0x18] sm:$0xff] %vm1943_vm4, %v1938_v31  ;;  %v1892_v28 = vmax.f32 %v1849_v48, %v1874_v1 }
 0x39e   : > { %v1912_v34 = vpop.permute.xlu0 %1911 }
 0x39f   : > { %v1931_v45 = vmax.f32 %v1848_v55, %v1912_v34 }
 0x3a0   : > { %v1914_v37 = vpop.permute.xlu1 %1913 }
 0x3a1   : > { %v1939_v46 = vmax.f32 %v1891_v43, %v1931_v45  ;;  %v1932_v52 = vmax.f32 %v1850_v54, %v1914_v37 }
 0x3a2   : > { %v1876_v4 = vpop.permute.xlu0 %1875 }
 0x3a3   : > { %1948 = vst.msk [vmem:[%s2678_s12 + $0x20] sm:$0xff] %vm1943_vm4, %v1939_v46  ;;  %v1940_v11 = vmax.f32 %v1892_v28, %v1932_v52  ;;  %v1893_v12 = vmax.f32 %v1851_v44, %v1876_v4 }
 0x3a4   : > { %v1878_v53 = vpop.permute.xlu1 %1877 }
 0x3a5   : > { %1949 = vst.msk [vmem:[%s2678_s12 + $0x28] sm:$0xff] %vm1943_vm4, %v1940_v11  ;;  %v1894_v50 = vmax.f32 %v1853_v19, %v1878_v53 }
 0x3a6   : > { %v1916_v35 = vpop.permute.xlu0 %1915 }
 0x3a7   : > { %v1933_v21 = vmax.f32 %v1852_v60, %v1916_v35 }
 0x3a8   : > { %v1918_v22 = vpop.permute.xlu1 %1917 }
 0x3a9   : > { %v1941_v62 = vmax.f32 %v1893_v12, %v1933_v21  ;;  %v1934_v18 = vmax.f32 %v1854_v10, %v1918_v22 }
 0x3ab   : > { %1950 = vst.msk [vmem:[%s2678_s12 + $0x30] sm:$0xff] %vm1943_vm4, %v1941_v62  ;;  %v1942_v32 = vmax.f32 %v1894_v50, %v1934_v18 }
 0x3ad   : > { %1951 = vst.msk [vmem:[%s2678_s12 + $0x38] sm:$0xff] %vm1943_vm4, %v1942_v32 }
 0x3ae PF: > { %s17_s24 = sadd.s32 1, %s2105_s24  }
 0x3af   : > { %p14_p4 = scmp.ge.s32.totalorder %s17_s24, 4  }
 0x3b1   :  { %16 = sbr.rel (!%p14_p4) target bundleno = 1 (0x1), region = 78 }

</bundles_post_ra>
